<compile_context>
chip_gen: v7x
topology: tpu7x:2x2x1
jax: 0.10.0
libtpu: 0.0.40
codegen_flags: <defaults>
</compile_context>

<pallas_src>
import math

import jax
import jax.numpy as jnp
from jax import lax
from jax.experimental import pallas as pl
from jax.experimental.pallas import tpu as pltpu


# --------------------------------------------------------------------------
# Pallas kernel 1: Model.tokenize() normalization (no-mask branch)
#   means = mean over time; x -= means; stdev = sqrt(var(x, unbiased=False)+1e-5)
#   x /= stdev; x = x.permute(0, 2, 1)
# The kernel consumes the raw (B, L, V) layout and emits (B, V, L) directly.
# --------------------------------------------------------------------------
def _norm_kernel(x_ref, xo_ref, mean_ref, std_ref):
    x = x_ref[...]                                    # (L, VB): vars lane-dense
    m = jnp.mean(x, axis=0, keepdims=True)            # (1, VB) sublane reduction
    xc = x - m
    var = jnp.mean(xc * xc, axis=0, keepdims=True)    # (1, VB)
    xo_ref[...] = (xc * lax.rsqrt(var + 1e-5)).T      # (VB, L): in-VMEM transpose
    mean_ref[...] = m
    std_ref[...] = jnp.sqrt(var + 1e-5)


def tokenize_normalize(x):
    """x: (B, L, V) float32 -> (x_norm (B,V,L), means (B,1,V), stdev (B,1,V)).

    Matches Model.tokenize (mask=None) up to and including permute(0,2,1).
    """
    B, L, V = x.shape
    vb = 128                                  # lane tile over variables (partial ok)
    nv = pl.cdiv(V, vb)

    out_shapes = (
        jax.ShapeDtypeStruct((B, V, L), jnp.float32),
        jax.ShapeDtypeStruct((B, 1, V), jnp.float32),
        jax.ShapeDtypeStruct((B, 1, V), jnp.float32),
    )
    x_bvl, means, stdev = pl.pallas_call(
        _norm_kernel,
        out_shape=out_shapes,
        grid=(B, nv),
        in_specs=[pl.BlockSpec((None, L, vb), lambda b, j: (b, 0, j))],
        out_specs=(
            pl.BlockSpec((None, vb, L), lambda b, j: (b, j, 0)),
            pl.BlockSpec((None, 1, vb), lambda b, j: (b, 0, j)),
            pl.BlockSpec((None, 1, vb), lambda b, j: (b, 0, j)),
        ),
        compiler_params=pltpu.CompilerParams(
            dimension_semantics=("parallel", "parallel"),
            vmem_limit_bytes=32 * 1024 * 1024,
        ),
    )(x)
    return x_bvl, means, stdev


# --------------------------------------------------------------------------
# Glue: torch F.interpolate(mode='bilinear', align_corners=False) on weights/bias
# (parameter setup only, plain JAX)
# --------------------------------------------------------------------------
def _linear_interp_params(in_size, out_size):
    scale = in_size / out_size
    dst = jnp.arange(out_size, dtype=jnp.float32)
    src = jnp.maximum(scale * (dst + 0.5) - 0.5, 0.0)
    i0 = jnp.minimum(jnp.floor(src).astype(jnp.int32), in_size - 1)
    i1 = jnp.minimum(i0 + 1, in_size - 1)
    l1 = src - i0.astype(jnp.float32)
    l0 = 1.0 - l1
    return i0, i1, l0, l1


def bilinear_resize_2d(w, out_h, out_w):
    in_h, in_w = w.shape
    if (in_h, in_w) == (out_h, out_w):
        return w
    r0, r1, rl0, rl1 = _linear_interp_params(in_h, out_h)
    c0, c1, cl0, cl1 = _linear_interp_params(in_w, out_w)
    rows = w[r0, :] * rl0[:, None] + w[r1, :] * rl1[:, None]
    return rows[:, c0] * cl0[None, :] + rows[:, c1] * cl1[None, :]


def linear_resize_1d(v, out_n):
    in_n = v.shape[0]
    if in_n == out_n:
        return v
    i0, i1, l0, l1 = _linear_interp_params(in_n, out_n)
    return v[i0] * l0 + v[i1] * l1


# --------------------------------------------------------------------------
# DynamicLinear (prompt2forecat): parameters + interpolation logic.
# Only the input-dependent matmul runs in Pallas (prompt_tail_project below).
# --------------------------------------------------------------------------
class DynamicLinearPallas:
    def __init__(self, in_features, out_features, fixed_in, key):
        assert fixed_in < in_features, "fixed_in < in_features is required !!!"
        self.in_features = in_features
        self.out_features = out_features
        self.fixed_in = fixed_in
        kw, kb = jax.random.split(key)
        # kaiming_uniform_(a=sqrt(5)) on (out, in) -> bound = 1/sqrt(fan_in); bias same
        bound = 1.0 / math.sqrt(in_features)
        self.weights = jax.random.uniform(kw, (out_features, in_features),
                                          jnp.float32, -bound, bound)
        self.bias = jax.random.uniform(kb, (out_features,), jnp.float32, -bound, bound)
        self._cache = {}

    def effective_params(self, in_feat, out_features):
        """Interpolated (out_features, in_feat) weight + bias (torch semantics)."""
        ck = ("eff", int(in_feat), int(out_features))
        if ck in self._cache:
            return self._cache[ck]
        fixed_w = self.weights[:, : self.fixed_in]
        dyn_w = self.weights[:, self.fixed_in:]
        bias = self.bias
        if in_feat != self.weights.shape[1] or out_features != self.weights.shape[0]:
            dyn_w = bilinear_resize_2d(dyn_w, out_features, in_feat - self.fixed_in)
            if self.fixed_in != 0:
                fixed_w = bilinear_resize_2d(fixed_w, out_features, self.fixed_in)
        if out_features != self.weights.shape[0]:
            bias = linear_resize_1d(bias, out_features)
        w_eff = jnp.concatenate([fixed_w, dyn_w], axis=1)
        self._cache[ck] = (w_eff, bias)
        return w_eff, bias

    def tail_params(self, in_feat, out_features, task_prompt_num, prompt_num, seq_tokens):
        """Last task_prompt_num rows only (the rows the forecast path consumes),
        split by input segment: prompt cols, token cols, mask-token cols (pre-summed)."""
        ck = ("tail", int(in_feat), int(out_features), int(task_prompt_num),
              int(prompt_num), int(seq_tokens))
        if ck in self._cache:
            return self._cache[ck]
        w_eff, b_eff = self.effective_params(in_feat, out_features)
        w_tail = w_eff[out_features - task_prompt_num:]             # (tp, in_feat)
        b_tail = b_eff[out_features - task_prompt_num:].reshape(-1, 1)
        wp = w_tail[:, :prompt_num]                                  # (tp, pn)
        wx = w_tail[:, prompt_num:prompt_num + seq_tokens]           # (tp, S)
        wm_sum = jnp.sum(w_tail[:, prompt_num + seq_tokens:], axis=1, keepdims=True)
        out = (wp, wx, wm_sum, b_tail)
        self._cache[ck] = out
        return out
    # TODO(synk): the general (non-forecast) DynamicLinear call path (used by the
    # imputation task) is not given a dedicated Pallas kernel here.


# --------------------------------------------------------------------------
# Pallas kernel 2: forecast-path DynamicLinear tail projection
#   out[b, v] = Wx(tp, S) @ tokens[b, v](S, D) + C[v](tp, D)
# --------------------------------------------------------------------------
def _pick_v_tile(v):
    for cand in (8, 4, 2, 1):
        if v % cand == 0:
            return cand
    return 1


def _tail_proj_kernel(wx_ref, c_ref, tok_ref, out_ref):
    w = wx_ref[...]                                   # (tp, S) resident
    for i in range(tok_ref.shape[0]):                 # static unroll over v-tile
        out_ref[i] = (jnp.dot(w, tok_ref[i], preferred_element_type=jnp.float32)
                      + c_ref[i])


def prompt_tail_project(x_tokens, wx, c):
    """x_tokens: (B,V,S,D); wx: (tp,S); c: (V,tp,D) -> (B,V,tp,D)."""
    B, V, S, D = x_tokens.shape
    tp = wx.shape[0]
    tv = _pick_v_tile(V)
    return pl.pallas_call(
        _tail_proj_kernel,
        out_shape=jax.ShapeDtypeStruct((B, V, tp, D), jnp.float32),
        grid=(B, V // tv),
        in_specs=[
            pl.BlockSpec((tp, S), lambda b, j: (0, 0)),              # weight, resident
            pl.BlockSpec((tv, tp, D), lambda b, j: (j, 0, 0)),       # per-var constant
            pl.BlockSpec((None, tv, S, D), lambda b, j: (b, j, 0, 0)),
        ],
        out_specs=pl.BlockSpec((None, tv, tp, D), lambda b, j: (b, j, 0, 0)),
        compiler_params=pltpu.CompilerParams(
            dimension_semantics=("parallel", "parallel"),
            vmem_limit_bytes=32 * 1024 * 1024,
        ),
    )(wx, c, x_tokens)


# --------------------------------------------------------------------------
# Model.prepare_prompt, 'forecast' branch.
# The virtual concat([prompt, tokens, mask_prompt]) is never materialized: the
# prompt / mask-token / bias contributions are batch-independent and folded into
# a per-variable constant; the kernel only contracts over the real tokens.
# --------------------------------------------------------------------------
def prepare_prompt_forecast(x_tokens, prefix_prompt, mask_token,
                            task_prompt_num, prompt_num, dyn_linear):
    B, V, S, D = x_tokens.shape
    pn = prefix_prompt.shape[2]
    L_tot = pn + S + task_prompt_num
    out_feat = L_tot - pn

    wp, wx, wm_sum, b_tail = dyn_linear.tail_params(L_tot, out_feat,
                                                    task_prompt_num, pn, S)

    # C[v] = Wp @ prompt[v] + (sum of mask-token weight cols) * mask[v] + bias
    c = (jnp.einsum("np,vpd->vnd", wp, prefix_prompt[0])
         + wm_sum[None, :, :] * mask_token[0]
         + b_tail[None, :, :]).astype(jnp.float32)                   # (V, tp, D)

    this_function_prompt = prompt_tail_project(x_tokens, wx, c)      # (B, V, tp, D)

    this_prompt = jnp.tile(prefix_prompt, (B, 1, 1, 1))
    x = jnp.concatenate([this_prompt, x_tokens, this_function_prompt], axis=2)
    # TODO(synk): LearnablePositionalEmbedding is not defined in the reference
    # source; the positional-embedding addition on x[:, :, prompt_num:] is omitted.
    return x


if __name__ == "__main__":
    key = jax.random.PRNGKey(0)
    k1, k2, k3, k4 = jax.random.split(key, 4)

    # Small shapes consistent with the module's forecast path
    B, L, V = 2, 16, 4            # batch, seq_len, enc_in (n_vars)
    d_model, prompt_num, patch_len = 32, 4, 8
    task_prompt_num = 3           # pred_token_windows_len

    # ---- tokenize(): normalization hot path in Pallas ----
    x_enc = jax.random.normal(k1, (B, L, V), jnp.float32)
    x_perm, means, stdev = tokenize_normalize(x_enc)                 # (B,V,L),(B,1,V),(B,1,V)

    m_ref = jnp.mean(x_enc, axis=1, keepdims=True)
    v_ref = jnp.var(x_enc, axis=1, keepdims=True)
    x_ref = jnp.transpose((x_enc - m_ref) / jnp.sqrt(v_ref + 1e-5), (0, 2, 1))
    assert float(jnp.max(jnp.abs(x_perm - x_ref))) < 1e-3
    assert float(jnp.max(jnp.abs(means - m_ref))) < 1e-4
    assert float(jnp.max(jnp.abs(stdev - jnp.sqrt(v_ref + 1e-5)))) < 1e-4

    # TODO(synk): PatchEmbedding is not defined in the reference source; patch/token
    # embeddings below are constructed synthetically instead of via the missing module.
    seq_token_len = L // patch_len
    x_tokens = jax.random.normal(k2, (B, V, seq_token_len, d_model), jnp.float32)

    # ---- prompt tokens (Model._init_tokens semantics) ----
    prefix_prompt = 0.02 * jax.random.normal(k3, (1, V, prompt_num, d_model), jnp.float32)
    mask_token = jnp.zeros((1, V, 1, d_model), jnp.float32)

    # ---- prompt2forecat = DynamicLinear(128, 128, fixed_in=prompt_num) ----
    dyn = DynamicLinearPallas(128, 128, fixed_in=prompt_num, key=k4)
    x_prep = prepare_prompt_forecast(x_tokens, prefix_prompt, mask_token,
                                     task_prompt_num, prompt_num, dyn)

    # reference check of the full DynamicLinear forecast path (torch semantics)
    this_prompt = jnp.tile(prefix_prompt, (B, 1, 1, 1))
    this_mask_prompt = jnp.tile(mask_token, (B, 1, task_prompt_num, 1))
    ifi = jnp.concatenate([this_prompt, x_tokens, this_mask_prompt], axis=-2)
    out_feat = ifi.shape[2] - prompt_num
    w_eff, b_eff = dyn.effective_params(ifi.shape[2], out_feat)
    y_full = jnp.einsum("nk,bvkd->bvnd", w_eff, ifi) + b_eff[None, None, :, None]
    tfp_ref = y_full[:, :, -task_prompt_num:]
    x_prep_ref = jnp.concatenate([this_prompt, x_tokens, tfp_ref], axis=2)
    assert float(jnp.max(jnp.abs(x_prep - x_prep_ref))) < 1e-2

    # TODO(synk): backbone Block(mixing_type='afno'), ForecastHead, CLSHead and
    # denormalize are not defined in the reference source and are not implemented.

    jax.block_until_ready((x_perm, means, stdev, x_prep))
    assert x_perm.shape == (B, V, L)
    assert x_prep.shape == (B, V, prompt_num + seq_token_len + task_prompt_num, d_model)
    print("KERNEL_OK")
</pallas_src>

<mosaic_0001>
module attributes {stable_mosaic.version = 11 : i64} {
  func.func @_norm_kernel(%arg0: i32, %arg1: i32, %arg2: memref<1x16x128xf32, #tpu.memory_space<vmem>>, %arg3: memref<1x128x16xf32, #tpu.memory_space<vmem>>, %arg4: memref<1x1x128xf32, #tpu.memory_space<vmem>>, %arg5: memref<1x1x128xf32, #tpu.memory_space<vmem>>) attributes {dimension_semantics = [#tpu.dimension_semantics<parallel>, #tpu.dimension_semantics<parallel>], iteration_bounds = array<i64: 2, 1>, scalar_prefetch = 0 : i64, scratch_operands = 0 : i64, tpu.core_type = #tpu.core_type<tc>, window_params = [{transform_indices = @transform_0, window_bounds = array<i64: 1, 16, 128>}, {transform_indices = @transform_1, window_bounds = array<i64: 1, 128, 16>}, {transform_indices = @transform_2, window_bounds = array<i64: 1, 1, 128>}, {transform_indices = @transform_3, window_bounds = array<i64: 1, 1, 128>}]} {
    %c0 = arith.constant 0 : index
    %c0_0 = arith.constant 0 : index
    %c0_1 = arith.constant 0 : index
    %0 = vector.load %arg2[%c0, %c0_0, %c0_1] : memref<1x16x128xf32, #tpu.memory_space<vmem>>, vector<1x16x128xf32>
    %1 = vector.shape_cast %0 : vector<1x16x128xf32> to vector<16x128xf32>
    %cst = arith.constant dense<0.000000e+00> : vector<128xf32>
    %2 = vector.multi_reduction <add>, %1, %cst [0] : vector<16x128xf32> to vector<128xf32>
    %3 = vector.shape_cast %2 : vector<128xf32> to vector<1x128xf32>
    %cst_2 = arith.constant 1.600000e+01 : f32
    %4 = vector.broadcast %cst_2 : f32 to vector<1x128xf32>
    %5 = arith.divf %3, %4 : vector<1x128xf32>
    %6 = vector.broadcast %5 : vector<1x128xf32> to vector<16x128xf32>
    %7 = arith.subf %1, %6 : vector<16x128xf32>
    %8 = arith.mulf %7, %7 : vector<16x128xf32>
    %cst_3 = arith.constant dense<0.000000e+00> : vector<128xf32>
    %9 = vector.multi_reduction <add>, %8, %cst_3 [0] : vector<16x128xf32> to vector<128xf32>
    %10 = vector.shape_cast %9 : vector<128xf32> to vector<1x128xf32>
    %cst_4 = arith.constant 1.600000e+01 : f32
    %11 = vector.broadcast %cst_4 : f32 to vector<1x128xf32>
    %12 = arith.divf %10, %11 : vector<1x128xf32>
    %cst_5 = arith.constant 9.99999974E-6 : f32
    %13 = vector.broadcast %cst_5 : f32 to vector<1x128xf32>
    %14 = arith.addf %12, %13 : vector<1x128xf32>
    %15 = math.rsqrt %14 : vector<1x128xf32>
    %16 = vector.broadcast %15 : vector<1x128xf32> to vector<16x128xf32>
    %17 = arith.mulf %7, %16 : vector<16x128xf32>
    %18 = tpu.transpose %17, [1, 0] : vector<16x128xf32> -> vector<128x16xf32>
    %c0_6 = arith.constant 0 : index
    %c0_7 = arith.constant 0 : index
    %c0_8 = arith.constant 0 : index
    %19 = vector.load %arg3[%c0_6, %c0_7, %c0_8] : memref<1x128x16xf32, #tpu.memory_space<vmem>>, vector<1x128x16xf32>
    %20 = vector.shape_cast %19 : vector<1x128x16xf32> to vector<128x16xf32>
    %21 = vector.shape_cast %18 : vector<128x16xf32> to vector<1x128x16xf32>
    tpu.vector_store %arg3[%c0_6, %c0_7, %c0_8], %21 {strides = array<i32>} : memref<1x128x16xf32, #tpu.memory_space<vmem>>, vector<1x128x16xf32>,
    %c0_9 = arith.constant 0 : index
    %c0_10 = arith.constant 0 : index
    %c0_11 = arith.constant 0 : index
    %22 = vector.load %arg4[%c0_9, %c0_10, %c0_11] : memref<1x1x128xf32, #tpu.memory_space<vmem>>, vector<1x1x128xf32>
    %23 = vector.shape_cast %22 : vector<1x1x128xf32> to vector<1x128xf32>
    %24 = vector.shape_cast %5 : vector<1x128xf32> to vector<1x1x128xf32>
    tpu.vector_store %arg4[%c0_9, %c0_10, %c0_11], %24 {strides = array<i32>} : memref<1x1x128xf32, #tpu.memory_space<vmem>>, vector<1x1x128xf32>,
    %cst_12 = arith.constant 9.99999974E-6 : f32
    %25 = vector.broadcast %cst_12 : f32 to vector<1x128xf32>
    %26 = arith.addf %12, %25 : vector<1x128xf32>
    %27 = math.sqrt %26 : vector<1x128xf32>
    %c0_13 = arith.constant 0 : index
    %c0_14 = arith.constant 0 : index
    %c0_15 = arith.constant 0 : index
    %28 = vector.load %arg5[%c0_13, %c0_14, %c0_15] : memref<1x1x128xf32, #tpu.memory_space<vmem>>, vector<1x1x128xf32>
    %29 = vector.shape_cast %28 : vector<1x1x128xf32> to vector<1x128xf32>
    %30 = vector.shape_cast %27 : vector<1x128xf32> to vector<1x1x128xf32>
    tpu.vector_store %arg5[%c0_13, %c0_14, %c0_15], %30 {strides = array<i32>} : memref<1x1x128xf32, #tpu.memory_space<vmem>>, vector<1x1x128xf32>,
    return
  }
  func.func @transform_0(%arg0: i32, %arg1: i32) -> (i32, i32, i32) {
    %c0_i32 = arith.constant 0 : i32
    %c0_i32_0 = arith.constant 0 : i32
    return %arg0, %c0_i32, %arg1 : i32, i32, i32
  }
  func.func @transform_1(%arg0: i32, %arg1: i32) -> (i32, i32, i32) {
    %c0_i32 = arith.constant 0 : i32
    %c0_i32_0 = arith.constant 0 : i32
    return %arg0, %arg1, %c0_i32 : i32, i32, i32
  }
  func.func @transform_2(%arg0: i32, %arg1: i32) -> (i32, i32, i32) {
    %c0_i32 = arith.constant 0 : i32
    %c0_i32_0 = arith.constant 0 : i32
    return %arg0, %c0_i32, %arg1 : i32, i32, i32
  }
  func.func @transform_3(%arg0: i32, %arg1: i32) -> (i32, i32, i32) {
    %c0_i32 = arith.constant 0 : i32
    %c0_i32_0 = arith.constant 0 : i32
    return %arg0, %c0_i32, %arg1 : i32, i32, i32
  }
}

</mosaic_0001>

<bundles_post_ra>
// kernel: tpu_custom_call.1
= control target key start
LH: loop header
LB: loop body
LE: loop exit
PB: predicated region body
PF: predicated region fallthrough
CT: control target
= control target key end

     0   :  { %9 = vsyncpa [#allocation3], 0  ;;  %s947_s0 = inlined_call_operand.vmem [shape: f32[2,16,4], index: 0, kind: input, shape index: {}]   ;;  %s948_s1 = inlined_call_operand.hbm [shape: f32[2,4,16], index: 1, kind: output, shape index: {0}]   ;;  %s949_s2 = inlined_call_operand.hbm [shape: f32[2,1,4], index: 2, kind: output, shape index: {1}]   ;;  %s950_s3 = inlined_call_operand.hbm [shape: f32[2,1,4], index: 3, kind: output, shape index: {2}]  }
   0x1   :  { %11 = vsyncpa [#allocation3 + $0x1], 0 }
   0x2   :  { %12 = vsyncpa [#allocation5], 0 }
   0x3   :  { %14 = vsyncpa [#allocation5 + $0x1], 0  ;;  %s735_s12 = smov 0   ;;  %s737_s13 = smov 0  }
   0x4   :  { %s739_s14 = smov 0   ;;  %s741_s15 = smov 0  }
   0x5   :  { %s743_s16 = smov 0   ;;  %s745_s17 = smov 0  }
   0x6 LB: > { %s490_s18 = sadd.s32 4294967295, %s708_s17   ;;  %s951_s19 = sadd.s32 4294967294, %s708_s17   ;;  %s708_s17 = sphi %s745_s17, %s20_s17   ;;  %s704_s16 = sphi %s743_s16, %s961_s16   ;;  %s700_s15 = sphi %s741_s15, %s960_s15   ;;  %s696_s14 = sphi %s739_s14, %s959_s14   ;;  %s692_s13 = sphi %s737_s13, %s958_s13   ;;  %s688_s12 = sphi %s735_s12, %s957_s12  }
   0x7   : > { %s32_s20 = sadd.s32 1, %s704_s16  ;;  %s69_s21 = sadd.s32 1, %s696_s14 }
   0x8   : > { %p34_p0 = scmp.ge.s32.totalorder %s32_s20, 2  ;;  %p79_p1 = scmp.ne.s32.totalorder %s696_s14, %s692_s13 }
   0x9   : > { %p80_p2 = scmp.eq.s32.totalorder %s490_s18, 1  ;;  %p85_p3 = scmp.ne.s32.totalorder %s692_s13, %s688_s12 }
   0xa   : > { %s963_s20 = smov (%p34_p0, %s32_s20), 0  ;;  %p86_p5 = scmp.eq.s32.totalorder %s951_s19, 1 }
   0xb   : > { %p777_p4 = por %p80_p2, %p79_p1  ;;  %s64_s23 = ssub.s32 %s704_s16, %s963_s20 }
   0xc   : > { %p494_p6 = scmp.ge.s32.totalorder %s708_s17, 1  ;;  %p67_p7 = scmp.eq.s32.totalorder %s64_s23, 0 }
   0xd   : > { %p786_p8 = por %p86_p5, %p85_p3  ;;  %p171_p9 = scmp.lt.s32.totalorder %s708_s17, 3 }
   0xe   : > { %s792_s25 = scalar_select %p67_p7, %s696_s14, %s69_s21  }
   0xf   : > { %p172_p10 = pnand %p494_p6, %p171_p9 }
  0x10   : > { %p206_p11 = scmp.lt.s32.totalorder (!%p172_p10), %s700_s15, 1  ;;  %s797_s27 = sand.u32 (!%p172_p10), 1, %s692_s13   ;;  %vm276_vm2 = vcmask (!%p172_p10), 130048  }
  0x11   : > { %175 = sbr.rel (%p172_p10) target bundleno = 343 (0x157), region = 24  ;;  %s199_s5 = scalar_lea.vmem (!%p172_p10), [#allocation4], %s797_s27 }
  0x12   : > { %s952_s6 = scalar_lea.vmem (!%p172_p10), [#allocation6], %s797_s27  ;;  %s810_s7 = sand.u32 (!%p172_p10), 1, %s490_s18  }
  0x13   : > { %s495_s8 = sshll.u32 (!%p172_p10), %s797_s27, 7  ;;  %s303_s10 = scalar_lea.sflag (!%p172_p10), [#allocation3], %s797_s27 }
  0x14   : > { %s813_s9 = scalar_lea.vmem (!%p172_p10), [#allocation2], %s495_s8  ;;  %s308_s11 = scalar_lea.sflag (!%p172_p10), [#allocation5], %s810_s7 }
  0x18   : > { %s207_s26 = scalar_select %p206_p11, %s700_s15, 1 }
  0x1a   : > { %s504_s28 = sshll.u32 %s207_s26, 4 }
  0x1b   : > { %s213_s4 = scalar_lea.vmem %s947_s0, %s504_s28 }
  0x1c   : > { %v217_v0 = vld [vmem:[%s213_s4] sm:$0xff]  ;;  %v218_v1 = vld [vmem:[%s213_s4 + $0x8] sm:$0xff] }
  0x1d   : > { %v219_v2 = vadd.f32 %v218_v1, %v217_v0 }
  0x1f   : > { %v220_v3 = vrot.slane %v219_v2, 4 }
  0x21   : > { %v221_v4 = vadd.f32 %v220_v3, %v219_v2 }
  0x23   : > { %v222_v5 = vrot.slane %v221_v4, 2 }
  0x25   : > { %v223_v6 = vadd.f32 %v222_v5, %v221_v4 }
  0x27   : > { %v224_v7 = vrot.slane %v223_v6, 1 }
  0x29   : > { %v225_v8 = vadd.f32 %v224_v7, %v223_v6 }
  0x2b   : > { %v227_v9 = vmul.f32 0.0625, %v225_v8 }
  0x2d   : > { %v228_v10 = vsub.f32 %v217_v0, %v227_v9  ;;  %v229_v11 = vsub.f32 %v218_v1, %v227_v9  ;;  %293 = vst [vmem:[%s199_s5] sm:$0x1] %v227_v9 }
  0x2f   : > { %v230_v12 = vmul.f32 %v228_v10, %v228_v10  ;;  %v231_v13 = vmul.f32 %v229_v11, %v229_v11 }
  0x31   : > { %v232_v14 = vadd.f32 %v231_v13, %v230_v12 }
  0x33   : > { %v233_v15 = vrot.slane %v232_v14, 4 }
  0x35   : > { %v234_v16 = vadd.f32 %v233_v15, %v232_v14 }
  0x37   : > { %v235_v17 = vrot.slane %v234_v16, 2 }
  0x39   : > { %v236_v18 = vadd.f32 %v235_v17, %v234_v16 }
  0x3b   : > { %v237_v19 = vrot.slane %v236_v18, 1 }
  0x3d   : > { %v238_v20 = vadd.f32 %v237_v19, %v236_v18 }
  0x3f   : > { %v239_v21 = vmul.f32 0.0625, %v238_v20 }
  0x41   : > { %v240_v22 = vadd.f32 1e-05, %v239_v21 }
  0x43   : > { %572 = vrsqrt.f32 %v240_v22  ;;  %vm296_vm0 = vcmp.eq.f32.partialorder %v240_v22, inf  ;;  %v299_v24 = vand.u32 2147483648, %v240_v22  ;;  %vm298_vm1 = vcmp.eq.f32.partialorder %v240_v22, 0.0 }
  0x4d   : > { %v573_v23 = vpop.eup %572 }
  0x4e   : > { %v242_v25 = vmul.f32 %v573_v23, %v228_v10  ;;  %v295_v26 = vmul.f32 %v573_v23, %v240_v22  ;;  %v243_v28 = vmul.f32 %v573_v23, %v229_v11 }
  0x50   : > { %v297_v27 = vsel %vm296_vm0, %v240_v22, %v295_v26  ;;  %244 = vxpose.xlu0.b32.start [1/2] (short) %v242_v25, 128 }
  0x51   : > { %v300_v29 = vsel %vm298_vm1, %v299_v24, %v297_v27 }
  0x52   : > { %301 = vst [vmem:[%s952_s6] sm:$0x1] %v300_v29 }
  0x54   : > { %245 = vxpose.xlu0.b32.end [2/2] (short) %v243_v28, 128 }
  0xd0   : > { %v260_v30 = vpop.trf.xlu0 }
  0xd1   : > { %277 = vst.msk [vmem:[%s813_s9] sm:$0xff] %vm276_vm2, %v260_v30 }
  0xd4   : > { %v261_v31 = vpop.trf.xlu0 }
  0xd5   : > { %278 = vst.msk [vmem:[%s813_s9 + $0x8] sm:$0xff] %vm276_vm2, %v261_v31 }
  0xd8   : > { %v262_v32 = vpop.trf.xlu0 }
  0xd9   : > { %279 = vst.msk [vmem:[%s813_s9 + $0x10] sm:$0xff] %vm276_vm2, %v262_v32 }
  0xdc   : > { %v263_v33 = vpop.trf.xlu0 }
  0xdd   : > { %280 = vst.msk [vmem:[%s813_s9 + $0x18] sm:$0xff] %vm276_vm2, %v263_v33 }
  0xe0   : > { %v264_v34 = vpop.trf.xlu0 }
  0xe1   : > { %281 = vst.msk [vmem:[%s813_s9 + $0x20] sm:$0xff] %vm276_vm2, %v264_v34 }
  0xe4   : > { %v265_v35 = vpop.trf.xlu0 }
  0xe5   : > { %282 = vst.msk [vmem:[%s813_s9 + $0x28] sm:$0xff] %vm276_vm2, %v265_v35 }
  0xe8   : > { %v266_v36 = vpop.trf.xlu0 }
  0xe9   : > { %283 = vst.msk [vmem:[%s813_s9 + $0x30] sm:$0xff] %vm276_vm2, %v266_v36 }
  0xec   : > { %v267_v37 = vpop.trf.xlu0 }
  0xed   : > { %284 = vst.msk [vmem:[%s813_s9 + $0x38] sm:$0xff] %vm276_vm2, %v267_v37 }
  0xf0   : > { %v268_v38 = vpop.trf.xlu0 }
  0xf1   : > { %285 = vst.msk [vmem:[%s813_s9 + $0x40] sm:$0xff] %vm276_vm2, %v268_v38 }
  0xf4   : > { %v269_v39 = vpop.trf.xlu0 }
  0xf5   : > { %286 = vst.msk [vmem:[%s813_s9 + $0x48] sm:$0xff] %vm276_vm2, %v269_v39 }
  0xf8   : > { %v270_v40 = vpop.trf.xlu0 }
  0xf9   : > { %287 = vst.msk [vmem:[%s813_s9 + $0x50] sm:$0xff] %vm276_vm2, %v270_v40 }
  0xfc   : > { %v271_v41 = vpop.trf.xlu0 }
  0xfd   : > { %288 = vst.msk [vmem:[%s813_s9 + $0x58] sm:$0xff] %vm276_vm2, %v271_v41 }
 0x100   : > { %v272_v42 = vpop.trf.xlu0 }
 0x101   : > { %289 = vst.msk [vmem:[%s813_s9 + $0x60] sm:$0xff] %vm276_vm2, %v272_v42 }
 0x104   : > { %v273_v43 = vpop.trf.xlu0 }
 0x105   : > { %290 = vst.msk [vmem:[%s813_s9 + $0x68] sm:$0xff] %vm276_vm2, %v273_v43 }
 0x107   : > { %317 = sbr.rel (!%p777_p4) target bundleno = 295 (0x127), region = 28 }
 0x108   : > { %v274_v44 = vpop.trf.xlu0 }
 0x109   : > { %291 = vst.msk [vmem:[%s813_s9 + $0x70] sm:$0xff] %vm276_vm2, %v274_v44 }
 0x10c   : > { %v275_v45 = vpop.trf.xlu0 }
 0x10d   : > { %292 = vst.msk [vmem:[%s813_s9 + $0x78] sm:$0xff] %vm276_vm2, %v275_v45 }
 0x10e   : > { %323 = vsyncadd %s303_s10, 1984  ;;  %s499_s18 = sshll.u32 %s700_s15, 6  ;;  %s329_s21 = sshll.u32 %s813_s9, 4  ;;  %s330_s21 = int_to_ptr.vmem [resolvable:$true] %s329_s21 }
 0x10f   : > { %s858_s28 = scalar_lea.hbm %s948_s1, %s499_s18  ;;  %s574_s29 = scalar_lea.vmem %s330_s21, 64 }
 0x110   : > { %p575_p12 = scmp.ne.s32.totalorder %s330_s21, %s574_s29  ;;  %s710_s30 = smov [#allocation2]  }
 0x111   : > { %s576_s4 = sshll.u32 %s710_s30, 4  ;;  %s577_s4 = int_to_ptr.vmem [resolvable:$false] %s576_s4 }
 0x112   : > { %s578_s8 = scalar_lea.vmem %s577_s4, 4096  ;;  %p579_p13 = scmp.lt.s32.totalorder %s330_s21, %s577_s4 }
 0x113   : > { %p580_p0 = scmp.lt.s32.totalorder %s578_s8, %s574_s29 }
 0x115   : > { %p581_p1 = por %p580_p0, %p579_p13 }
 0x117   : > { %p582_p2 = pnand %p581_p1, %p575_p12 }
 0x119   : > { %585 = shalt.err (!%p582_p2)
}
 0x11a   : > { %s586_s9 = scalar_lea.hbm %s858_s28, 64  ;;  %s588_s26 = scalar_lea.hbm %s948_s1, 128 }
 0x11b   : > { %p587_p3 = scmp.ne.s32.totalorder %s858_s28, %s586_s9  ;;  %p589_p5 = scmp.lt.u32.totalorder %s858_s28, %s948_s1 }
 0x11c   : > { %p590_p6 = scmp.lt.u32.totalorder %s588_s26, %s586_s9  ;;  %p592_p9 = scmp.lt.u32.totalorder %s586_s9, %s858_s28 }
 0x11e   : > { %p591_p7 = por %p590_p6, %p589_p5 }
 0x120   : > { %p593_p10 = por %p592_p9, %p591_p7 }
 0x122   : > { %p594_p11 = pnand %p593_p10, %p587_p3 }
 0x124   : > { %597 = shalt.err (!%p594_p11)
}
 0x125   : > { %s711_s29 = smov 64   ;;  %s712_s30 = smov 4  }
 0x126   : > { %335 = dma.vmem_to_hbm [thread:$0]  %s330_s21, 64, %s858_s28, %s303_s10, %s711_s29, %s711_s29, %s712_s30  }
 0x127 PF: > { %s500_s4 = sshll.u32 %s700_s15, 4  ;;  %s346_s19 = sshll.u32 %s199_s5, 4  ;;  %s347_s19 = int_to_ptr.vmem [resolvable:$true] %s346_s19 }
 0x128   : > { %s344_s9 = scalar_lea.hbm %s949_s2, %s500_s4  ;;  %s598_s18 = scalar_lea.vmem %s347_s19, 16 }
 0x129   : > { %p599_p12 = scmp.ne.s32.totalorder %s347_s19, %s598_s18  ;;  %s713_s10 = smov [#allocation4]  }
 0x12a   : > { %s602_s21 = sshll.u32 %s713_s10, 4  ;;  %s603_s21 = int_to_ptr.vmem [resolvable:$false] %s602_s21 }
 0x12b   : > { %p600_p13 = pnand %p599_p12, %p777_p4  ;;  %s604_s28 = scalar_lea.vmem %s603_s21, 32 }
 0x12c   : > { %p605_p1 = scmp.lt.s32.totalorder %s347_s19, %s603_s21  ;;  %p606_p2 = scmp.lt.s32.totalorder %s604_s28, %s598_s18 }
 0x12d   : > { %p601_p0 = pneg %p600_p13 }
 0x12e   : > { %p607_p3 = por %p606_p2, %p605_p1 }
 0x130   : > { %p608_p5 = pnand %p607_p3, %p601_p0 }
 0x132   : > { %611 = shalt.err (!%p608_p5)
}
 0x133   : > { %s612_s5 = scalar_lea.hbm %s344_s9, 16  ;;  %s616_s29 = scalar_lea.hbm %s949_s2, 32 }
 0x134   : > { %p613_p6 = scmp.ne.s32.totalorder %s344_s9, %s612_s5  ;;  %p617_p10 = scmp.lt.u32.totalorder %s344_s9, %s949_s2 }
 0x135   : > { %p618_p11 = scmp.lt.u32.totalorder %s616_s29, %s612_s5  ;;  %p620_p13 = scmp.lt.u32.totalorder %s612_s5, %s344_s9 }
 0x136   : > { %p614_p7 = pnand %p613_p6, %p777_p4 }
 0x137   : > { %p619_p12 = por %p618_p11, %p617_p10 }
 0x138   : > { %p615_p9 = pneg %p614_p7 }
 0x139   : > { %p621_p1 = por %p620_p13, %p619_p12 }
 0x13b   : > { %p622_p0 = pnand %p621_p1, %p615_p9 }
 0x13d   : > { %625 = shalt.err (!%p622_p0)
}
 0x13e   : > { %505 = dma.vmem_to_hbm [thread:$0]  (%p777_p4), %s347_s19, 16, %s344_s9, %s308_s11  }
 0x13f   : > { %s900_s10 = scalar_lea.hbm %s950_s3, %s500_s4  ;;  %s955_s21 = scalar_lea.vmem [#allocation6], %s797_s27 }
 0x140   : > { %s360_s28 = sshll.u32 %s955_s21, 4  ;;  %s714_s23 = smov [#allocation6]   ;;  %s361_s28 = int_to_ptr.vmem [resolvable:$true] %s360_s28 }
 0x141   : > { %s626_s5 = scalar_lea.vmem %s361_s28, 16  ;;  %s630_s26 = sshll.u32 %s714_s23, 4  ;;  %s631_s26 = int_to_ptr.vmem [resolvable:$false] %s630_s26 }
 0x142   : > { %p627_p2 = scmp.ne.s32.totalorder %s361_s28, %s626_s5  ;;  %s632_s29 = scalar_lea.vmem %s631_s26, 32 }
 0x143   : > { %p633_p6 = scmp.lt.s32.totalorder %s361_s28, %s631_s26  ;;  %p634_p7 = scmp.lt.s32.totalorder %s632_s29, %s626_s5 }
 0x144   : > { %p628_p3 = pnand %p627_p2, %p777_p4 }
 0x145   : > { %p635_p9 = por %p634_p7, %p633_p6 }
 0x146   : > { %p629_p5 = pneg %p628_p3 }
 0x148   : > { %p636_p10 = pnand %p635_p9, %p629_p5 }
 0x14a   : > { %639 = shalt.err (!%p636_p10)
}
 0x14b   : > { %s640_s15 = scalar_lea.hbm %s900_s10, 16  ;;  %s644_s19 = scalar_lea.hbm %s950_s3, 32 }
 0x14c   : > { %p641_p11 = scmp.ne.s32.totalorder %s900_s10, %s640_s15  ;;  %p645_p1 = scmp.lt.u32.totalorder %s900_s10, %s950_s3 }
 0x14d   : > { %p646_p0 = scmp.lt.u32.totalorder %s644_s19, %s640_s15  ;;  %p648_p3 = scmp.lt.u32.totalorder %s640_s15, %s900_s10 }
 0x14e   : > { %p642_p12 = pnand %p641_p11, %p777_p4 }
 0x14f   : > { %p647_p2 = por %p646_p0, %p645_p1 }
 0x150   : > { %p643_p13 = pneg %p642_p12 }
 0x151   : > { %p649_p5 = por %p648_p3, %p647_p2 }
 0x153   : > { %p650_p6 = pnand %p649_p5, %p643_p13 }
 0x155   : > { %653 = shalt.err (!%p650_p6)
}
 0x156   : > { %506 = dma.vmem_to_hbm [thread:$0]  (%p777_p4), %s361_s28, 16, %s900_s10, %s308_s11  }
 0x157 PF: > { %p520_p7 = scmp.ge.s32.totalorder %s708_s17, 2  ;;  %s372_s6 = sand.u32 1, %s688_s12  }
 0x158   : > { %s373_s8 = scalar_lea.sflag [#allocation3], %s372_s6 }
 0x159   : > { %p511_p9 = pnand %p520_p7, %p786_p8 }
 0x15b   : > { %679 = dma.done.wait (!%p511_p9), %s373_s8, 2048  }
 0x15c   : > { %681 = vsyncadd (!%p511_p9), %s373_s8, 4294965248  ;;  %s956_s18 = sadd.s32 4294967294, %s708_s17  }
 0x15d   : > { %s381_s21 = sand.u32 1, %s956_s18  }
 0x15e   : > { %s382_s5 = scalar_lea.sflag [#allocation5], %s381_s21 }
 0x15f   : > { %683 = dma.done.wait (!%p511_p9), %s382_s5, 32  }
 0x160   : > { %685 = vsyncadd (!%p511_p9), %s382_s5, 4294967264  ;;  %s20_s17 = sadd.s32 1, %s708_s17   ;;  %s957_s12 = smov %s692_s13 }
 0x161   : > { %p17_p4 = scmp.ge.s32.totalorder %s20_s17, 4   ;;  %s958_s13 = smov %s696_s14 }
 0x162   : > { %s959_s14 = smov %s792_s25  ;;  %s960_s15 = smov %s704_s16 }
 0x163   : > { %s961_s16 = smov %s963_s20  ;;  %19 = sbr.rel (!%p17_p4) target bundleno = 6 (0x6), region = 91 }
 0x16a   :  { %394 = vsyncpa [#allocation3], 1 }
 0x16b   :  { %396 = vsyncpa [#allocation3 + $0x1], 1 }
 0x16c   :  { %397 = vsyncpa [#allocation5], 1 }
 0x16d   :  { %399 = vsyncpa [#allocation5 + $0x1], 1 }

</bundles_post_ra>
